<compile_context>
chip_gen: v5e
topology: v5e:2x2
jax: 0.10.0
libtpu: 0.0.40
codegen_flags: <defaults>
</compile_context>

<pallas_src>
import jax
import jax.numpy as jnp
from jax.experimental import pallas as pl
from jax.experimental.pallas import tpu as pltpu

LANE = 128          # TPU lane width (last-dim tiling unit)
SUBLANE = 8         # f32 sublane width (second-to-last dim tiling unit)
MAX_BLOCK_B = 256   # batch tile cap
MAX_BLOCK_N = 512   # output-column tile cap (v6e sweet spot)


def _round_up(x, m):
    return (x + m - 1) // m * m


def _tpu_vmem_bytes():
    try:
        return int(pltpu.get_tpu_info().vmem_capacity_bytes)
    except Exception:
        return 128 << 20   # v5e / v6e physical VMEM


def _num_tensorcores():
    # v7x has 2 TensorCores per chip; v5e / v6e have 1.
    try:
        kind = jax.devices()[0].device_kind.lower()
    except Exception:
        return 1
    return 2 if ("v7" in kind or "7x" in kind or "tpu7" in kind) else 1


# ----------------------------------------------------------------------------
# Kernel: one (block_b, block_n) output tile = matmul (MXU, f32 acc)
#         + bias add (VPU) + tanh (EUP) + cast/store.
#         o_ref may be narrower than the compute tile (unpadded output);
#         the static slice below is a no-op for full-width tiles.
# ----------------------------------------------------------------------------
def time_embedding_kernel(t_ref, w_ref, b_ref, o_ref):
    acc = jnp.dot(t_ref[...], w_ref[...], preferred_element_type=jnp.float32)
    acc = acc + b_ref[...].astype(jnp.float32)          # (bb, bn) + (1, bn)
    o_ref[...] = jnp.tanh(acc[:, : o_ref.shape[1]]).astype(o_ref.dtype)


# ----------------------------------------------------------------------------
# Parameter init / one-time packing (outside the hot path)
# ----------------------------------------------------------------------------
def init_time_embedding_params(key, input_dim, output_dim, dtype=jnp.float32):
    """PyTorch nn.Linear default init: U(-1/sqrt(in), 1/sqrt(in))."""
    k_w, k_b = jax.random.split(key)
    bound = 1.0 / float(input_dim) ** 0.5
    weight = jax.random.uniform(k_w, (output_dim, input_dim), dtype,
                                minval=-bound, maxval=bound)
    bias = jax.random.uniform(k_b, (output_dim,), dtype,
                              minval=-bound, maxval=bound)
    return weight, bias


def pack_params(weight, bias):
    """One-time layout transform: W (O,I) -> (K_pad, N_pad) transposed,
    zero-padded to sublane-aligned K and lane-aligned N; bias -> (1, N_pad)."""
    output_dim, input_dim = weight.shape
    k_pad = _round_up(input_dim, SUBLANE)
    n_pad = _round_up(output_dim, LANE)
    w_packed = jnp.zeros((k_pad, n_pad), weight.dtype)
    w_packed = w_packed.at[:input_dim, :output_dim].set(weight.T)
    b_packed = jnp.zeros((1, n_pad), bias.dtype)
    b_packed = b_packed.at[:, :output_dim].set(bias)
    return w_packed, b_packed


# ----------------------------------------------------------------------------
# Tile selection under a VMEM budget
# ----------------------------------------------------------------------------
def _pick_tiles(B, k_pad, n_pad, itemsize, vmem_bytes, num_tc):
    budget = int(0.45 * vmem_bytes)   # headroom for regalloc / internal scratch

    block_b = B if B <= MAX_BLOCK_B else MAX_BLOCK_B
    block_n = min(n_pad, MAX_BLOCK_N)

    def working_set(bb, bn):
        # double-buffered t / weight / bias / out tiles
        return 2 * itemsize * (bb * k_pad + k_pad * bn + bn + bb * bn)

    # Shrink the N tile first (batch is the cheaper axis to re-stream), then
    # the batch tile; always keep (8,128)-aligned tiles.
    while block_n > LANE and working_set(block_b, block_n) > budget:
        block_n -= LANE
    while block_b > SUBLANE and working_set(block_b, block_n) > budget:
        block_b = max(SUBLANE, (block_b - SUBLANE) // SUBLANE * SUBLANE)
    # TODO(synk): if the working set still exceeds the budget (input_dim in the
    # many thousands), add a K-reduction grid axis with a f32 VMEM accumulator.

    # v7x: make sure a "parallel" axis has >= 2 steps so both TensorCores work.
    if num_tc > 1 and pl.cdiv(n_pad, block_n) * pl.cdiv(B, block_b) < num_tc:
        if n_pad >= 2 * LANE:
            block_n = _round_up(pl.cdiv(n_pad, num_tc), LANE)
        elif B > SUBLANE:
            block_b = _round_up(pl.cdiv(B, num_tc), SUBLANE)

    return block_b, block_n, working_set(block_b, block_n)


# ----------------------------------------------------------------------------
# Forward wrapper
# ----------------------------------------------------------------------------
def time_embedding(t, w_packed, b_packed, output_dim):
    """t: (B, input_dim); w_packed: (K_pad, N_pad); b_packed: (1, N_pad)."""
    B = t.shape[0]
    k_pad, n_pad = w_packed.shape
    if t.shape[1] != k_pad:                       # sublane-align K (rarely hit)
        t = jnp.pad(t, ((0, 0), (0, k_pad - t.shape[1])))

    vmem_bytes = _tpu_vmem_bytes()
    num_tc = _num_tensorcores()
    itemsize = max(jnp.dtype(t.dtype).itemsize,
                   jnp.dtype(w_packed.dtype).itemsize)
    block_b, block_n, working = _pick_tiles(B, k_pad, n_pad, itemsize,
                                            vmem_bytes, num_tc)

    # N on the OUTER axis, batch on the INNER axis: weight tile index only
    # changes on the outer axis -> weight streamed from HBM exactly once.
    grid_n = pl.cdiv(n_pad, block_n)
    grid_b = pl.cdiv(B, block_b)
    grid = (grid_n, grid_b)

    # Output is written unpadded. Out-tile width equals block_n (lane-dense
    # unmasked stores) except when output_dim itself is narrower than one tile.
    block_n_out = block_n if output_dim >= block_n else output_dim

    t_bytes = B * k_pad * jnp.dtype(t.dtype).itemsize
    w_bytes = k_pad * n_pad * jnp.dtype(w_packed.dtype).itemsize
    b_bytes = n_pad * jnp.dtype(b_packed.dtype).itemsize
    o_bytes = B * output_dim * jnp.dtype(t.dtype).itemsize
    cost = pl.CostEstimate(
        flops=2 * B * k_pad * n_pad,
        transcendentals=B * output_dim,
        bytes_accessed=t_bytes * grid_n + w_bytes + b_bytes + o_bytes,
    )

    vmem_limit = min(int(0.85 * vmem_bytes),
                     max(32 << 20, working + (8 << 20)))

    out = pl.pallas_call(
        time_embedding_kernel,
        out_shape=jax.ShapeDtypeStruct((B, output_dim), t.dtype),
        grid_spec=pltpu.PrefetchScalarGridSpec(
            num_scalar_prefetch=0,
            grid=grid,
            in_specs=[
                # t: depends only on the (inner) batch axis
                pl.BlockSpec((block_b, k_pad), lambda n, b: (b, 0)),
                # weight: depends only on the (outer) N axis -> resident across
                # the inner batch loop, streamed once total
                pl.BlockSpec((k_pad, block_n), lambda n, b: (0, n)),
                # bias: depends only on the (outer) N axis
                pl.BlockSpec((1, block_n), lambda n, b: (0, n)),
            ],
            out_specs=pl.BlockSpec((block_b, block_n_out), lambda n, b: (b, n)),
        ),
        compiler_params=pltpu.CompilerParams(
            dimension_semantics=("parallel", "parallel"),
            vmem_limit_bytes=vmem_limit,
        ),
        cost_estimate=cost,
    )(t, w_packed, b_packed)
    return out


def reference(t, weight, bias):
    return jnp.tanh(t @ weight.T + bias)


if __name__ == "__main__":
    key = jax.random.PRNGKey(0)
    k_params, k_t = jax.random.split(key)

    batch, input_dim, output_dim = 8, 16, 32

    weight, bias = init_time_embedding_params(k_params, input_dim, output_dim)
    w_packed, b_packed = pack_params(weight, bias)      # one-time, not per call

    t = jax.random.normal(k_t, (batch, input_dim), jnp.float32)

    out = time_embedding(t, w_packed, b_packed, output_dim)
    out = jax.block_until_ready(out)

    ref = reference(t, weight, bias)
    assert out.shape == (batch, output_dim)
    assert jnp.allclose(out, ref, atol=1e-5, rtol=1e-5)

    print("KERNEL_OK")
</pallas_src>

<mosaic_0001>
module attributes {stable_mosaic.version = 11 : i64} {
  func.func @time_embedding_kernel(%arg0: i32, %arg1: i32, %arg2: memref<8x16xf32, #tpu.memory_space<vmem>>, %arg3: memref<16x128xf32, #tpu.memory_space<vmem>>, %arg4: memref<1x128xf32, #tpu.memory_space<vmem>>, %arg5: memref<8x32xf32, #tpu.memory_space<vmem>>) attributes {dimension_semantics = [#tpu.dimension_semantics<parallel>, #tpu.dimension_semantics<parallel>], iteration_bounds = array<i64: 1, 1>, scalar_prefetch = 0 : i64, scratch_operands = 0 : i64, tpu.core_type = #tpu.core_type<tc>, window_params = [{transform_indices = @transform_0, window_bounds = array<i64: 8, 16>}, {transform_indices = @transform_1, window_bounds = array<i64: 16, 128>}, {transform_indices = @transform_2, window_bounds = array<i64: 1, 128>}, {transform_indices = @transform_3, window_bounds = array<i64: 8, 32>}]} {
    %c0 = arith.constant 0 : index
    %c0_0 = arith.constant 0 : index
    %0 = vector.load %arg2[%c0, %c0_0] : memref<8x16xf32, #tpu.memory_space<vmem>>, vector<8x16xf32>
    %c0_1 = arith.constant 0 : index
    %c0_2 = arith.constant 0 : index
    %1 = vector.load %arg3[%c0_1, %c0_2] : memref<16x128xf32, #tpu.memory_space<vmem>>, vector<16x128xf32>
    %cst = arith.constant dense<0.000000e+00> : vector<8x128xf32>
    %2 = tpu.matmul %0, %1, %cst {dimension_numbers = #tpu.dot_dimension_numbers<[1], [0], [0], [1], [0, 0, 1, 1], [], []>} : vector<8x16xf32>, vector<16x128xf32>, vector<8x128xf32> -> vector<8x128xf32>
    %c0_3 = arith.constant 0 : index
    %c0_4 = arith.constant 0 : index
    %3 = vector.load %arg4[%c0_3, %c0_4] : memref<1x128xf32, #tpu.memory_space<vmem>>, vector<1x128xf32>
    %4 = vector.broadcast %3 : vector<1x128xf32> to vector<8x128xf32>
    %5 = arith.addf %2, %4 : vector<8x128xf32>
    %6 = vector.extract_strided_slice %5 {offsets = [0, 0], sizes = [8, 32], strides = [1, 1]} : vector<8x128xf32> to vector<8x32xf32>
    %7 = math.tanh %6 : vector<8x32xf32>
    %c0_5 = arith.constant 0 : index
    %c0_6 = arith.constant 0 : index
    %8 = vector.load %arg5[%c0_5, %c0_6] : memref<8x32xf32, #tpu.memory_space<vmem>>, vector<8x32xf32>
    tpu.vector_store %arg5[%c0_5, %c0_6], %7 {strides = array<i32>} : memref<8x32xf32, #tpu.memory_space<vmem>>, vector<8x32xf32>,
    return
  }
  func.func @transform_0(%arg0: i32, %arg1: i32) -> (i32, i32) {
    %c0_i32 = arith.constant 0 : i32
    %c0_i32_0 = arith.constant 0 : i32
    return %arg1, %c0_i32 : i32, i32
  }
  func.func @transform_1(%arg0: i32, %arg1: i32) -> (i32, i32) {
    %c0_i32 = arith.constant 0 : i32
    %c0_i32_0 = arith.constant 0 : i32
    return %c0_i32, %arg0 : i32, i32
  }
  func.func @transform_2(%arg0: i32, %arg1: i32) -> (i32, i32) {
    %c0_i32 = arith.constant 0 : i32
    %c0_i32_0 = arith.constant 0 : i32
    return %c0_i32, %arg0 : i32, i32
  }
  func.func @transform_3(%arg0: i32, %arg1: i32) -> (i32, i32) {
    %c0_i32 = arith.constant 0 : i32
    return %arg1, %arg0 : i32, i32
  }
}

</mosaic_0001>

<bundles_post_ra>
// kernel: tpu_custom_call.1
= control target key start
LH: loop header
LB: loop body
LE: loop exit
PB: predicated region body
PF: predicated region fallthrough
CT: control target
= control target key end

     0   :  { %8 = vsyncpa [#allocation3], 0  ;;  %s221_s0 = inlined_call_operand.hbm [shape: f32[8,16], index: 0, kind: input, shape index: {}]   ;;  %s222_s1 = inlined_call_operand.hbm [shape: f32[16,128], index: 1, kind: input, shape index: {}]   ;;  %s223_s2 = inlined_call_operand.vmem [shape: f32[1,128], index: 2, kind: input, shape index: {}]   ;;  %s224_s3 = inlined_call_operand.hbm [shape: f32[8,32], index: 3, kind: output, shape index: {}]  }
   0x1   :  { %9 = vsyncpa [#allocation6], 0 }
   0x2   :  { %10 = vsyncpa [#allocation4], 0  ;;  %s16_s14 = sshll.u32 %s221_s0, 4  ;;  %s184_s15 = smov [#allocation2]   ;;  %s17_s14 = int_to_ptr.hbm [resolvable:$true] %s16_s14 }
   0x3   :  { %s18_s16 = sshll.u32 %s184_s15, 4  ;;  %s26_s19 = sshll.u32 %s222_s1, 4  ;;  %s19_s16 = int_to_ptr.vmem [resolvable:$true] %s18_s16  ;;  %s27_s19 = int_to_ptr.hbm [resolvable:$true] %s26_s19 }
   0x4   :  { %21 = dma.hbm_to_vmem [thread:$0]  %s17_s14, 128, %s19_s16, [#allocation3]  }
   0x5   :  { %s185_s20 = smov [#allocation5]   ;;  %s186_s22 = smov 128  }
   0x6   :  { %s28_s21 = sshll.u32 %s185_s20, 4  ;;  %s187_s23 = smov 8   ;;  %s29_s21 = int_to_ptr.vmem [resolvable:$true] %s28_s21 }
   0x7   :  { %34 = dma.hbm_to_vmem [thread:$0]  %s27_s19, 256, %s29_s21, [#allocation6], %s186_s22, %s186_s22, %s187_s23  }
   0x8   :  { %178 = dma.done.wait [#allocation3], 128  }
   0x9   :  { %179 = vsyncadd [#allocation3], 4294967168 }
   0xa   :  { %180 = dma.done.wait [#allocation6], 256  }
   0xb   :  { %181 = vsyncadd [#allocation6], 4294967040  ;;  %v47_v0 = vld [vmem:[#allocation5 + $0x8] sm:$0xff]  ;;  %v46_v1 = vld [vmem:[#allocation5] sm:$0xff]  ;;  %vm52_vm0 = vcmask 130048   ;;  %s188_s24 = smov [#allocation7]  }
   0xc   :  { %70 = vmatpush.msra.mxu0 %v47_v0  ;;  %v45_v2 = vld [vmem:[#allocation2] sm:$0xff]  ;;  %s84_s25 = sshll.u32 %s188_s24, 4  ;;  %s86_s28 = sshll.u32 %s224_s3, 4  ;;  %vm77_vm1 = vcmask 261120   ;;  %s85_s25 = int_to_ptr.vmem [resolvable:$true] %s84_s25  ;;  %s87_s28 = int_to_ptr.hbm [resolvable:$true] %s86_s28 }
   0xd   :  { %v103_v3 = vld [vmem:[%s223_s2] ss:$0 sm:$0xff] }
   0xe   :  { %71 = vmatpush.msra.mxu0 %v46_v1 }
   0xf   :  { %97 = vmatmul.msk.f32.vlgmr.msra.gmra.mxu0 %vm52_vm0, %v45_v2 }
  0x8c   :  { %v73_v4 = vpop.f32.mrf.mxu0 }
  0x8d   :  { %v74_v5 = vadd.f32 %v103_v3, %v73_v4 }
  0x8f   :  { %104 = vtanh.f32 %v74_v5 }
  0x95   :  { %v105_v6 = vpop.eup %104 }
  0x96   :  { %78 = vst.msk [vmem:[#allocation7] sm:$0xff] %vm77_vm1, %v105_v6 }
  0x97   :  { %89 = dma.vmem_to_hbm [thread:$0]  %s85_s25, 128, %s87_s28, [#allocation4]  }
  0x98   :  { %182 = dma.done.wait [#allocation4], 128  }
  0x99   :  { %183 = vsyncadd [#allocation4], 4294967168 }
  0x9a   :  { %94 = vsyncpa [#allocation3], 1 }
  0x9b   :  { %95 = vsyncpa [#allocation6], 1 }
  0x9c   :  { %96 = vsyncpa [#allocation4], 1 }

</bundles_post_ra>
